<compile_context>
chip_gen: v5e
topology: v5e:2x2
jax: 0.10.0
libtpu: 0.0.40
codegen_flags: <defaults>
</compile_context>

<pallas_src>
import functools

import jax
import jax.numpy as jnp
from jax.experimental import pallas as pl
from jax.experimental.pallas import tpu as pltpu


# ----------------------------------------------------------------------------
# helpers
# ----------------------------------------------------------------------------
def _round_up(x, m):
    return (x + m - 1) // m * m


def _vmem_caps():
    """(physical VMEM bytes per core, scoped budget we allow ourselves)."""
    cap = None
    try:
        cap = int(pltpu.get_tpu_info().vmem_capacity_bytes)
    except Exception:
        cap = None
    if cap is None:
        try:
            kind = jax.devices()[0].device_kind.lower()
        except Exception:
            kind = ""
        if "v2" in kind or "v3" in kind:
            cap = 16 << 20
        elif "v4" in kind or "v5" in kind or "v6" in kind:
            cap = 128 << 20
        else:
            cap = 64 << 20          # v7x-sized conservative default
    budget = min(int(cap * 7 // 10), 100 << 20)
    return cap, budget


def _choose_tm(M, tm_cap):
    """Largest row tile <= tm_cap (multiple of 8). Prefer one dividing the
    8-rounded M so no M padding / trailing-slice HBM pass is needed."""
    tm_cap = max(8, min(int(tm_cap), _round_up(M, 8)))
    tm_cap -= tm_cap % 8
    tm_cap = max(tm_cap, 8)
    m8 = _round_up(M, 8)
    tm = tm_cap
    while tm >= max(8, tm_cap // 2):   # never shrink below half the cap
        if m8 % tm == 0:
            return tm, m8
        tm -= 8
    return tm_cap, _round_up(M, tm_cap)


def _plan(M, K, Cout, in_bytes):
    """Pick tiles + vmem limit.  Path 'single': tk == K (weight resident).
    Path 'split': K-reduction grid with f32 accumulator (huge K only)."""
    cap, budget = _vmem_caps()
    sub = 8 * 4 // in_bytes                      # sublane multiple (8 f32, 16 bf16)

    # ---- Plan A: single K step, weight + bias resident in VMEM ------------
    K_a = _round_up(K, sub)
    w_bytes = 2 * K_a * Cout * in_bytes + 2 * Cout * 4
    per_row = 2 * K_a * in_bytes + 2 * Cout * 4          # dbl-buffered A + out row
    if budget > w_bytes + 8 * per_row:
        tm_cap = min((budget - w_bytes) // per_row, 4096)
        if M > 8:                                # >=2 parallel tiles (v7x megacore)
            tm_cap = min(tm_cap, max(8, _round_up((M + 1) // 2, 8)))
        tm, M_pad = _choose_tm(M, tm_cap)
        footprint = w_bytes + tm * per_row
        vmem_limit = int(min(max(footprint * 5 // 4 + (2 << 20), 16 << 20), cap))
        return dict(path="single", tm=tm, M_pad=M_pad, K_pad=K_a, tk=K_a,
                    vmem_limit=vmem_limit)

    # ---- Plan B: K-reduction grid with f32 accumulator --------------------
    K_b = _round_up(K, 128)
    tk, w_bytes, per_row = 128, 0, 1
    for cand in (2048, 1536, 1024, 768, 512, 384, 256, 128):
        if K_b % cand:
            continue
        tk = cand
        w_bytes = 2 * tk * Cout * in_bytes + 2 * Cout * 4
        per_row = 2 * tk * in_bytes + 2 * Cout * 4 + Cout * 4   # + acc scratch
        if budget > w_bytes + 8 * per_row:
            break
    tm_cap = max((budget - w_bytes) // max(per_row, 1), 8)
    tm_cap = min(tm_cap, 2048)
    if M > 8:
        tm_cap = min(tm_cap, max(8, _round_up((M + 1) // 2, 8)))
    tm, M_pad = _choose_tm(M, tm_cap)
    footprint = w_bytes + tm * per_row
    vmem_limit = int(min(max(footprint * 5 // 4 + (2 << 20), 16 << 20), cap))
    return dict(path="split", tm=tm, M_pad=M_pad, K_pad=K_b, tk=tk,
                vmem_limit=vmem_limit)


# ----------------------------------------------------------------------------
# Pallas kernels
# ----------------------------------------------------------------------------
def _gemm_bias_relu_kernel(a_ref, w_ref, b_ref, o_ref, *, has_relu):
    # Single K step: a (tm, K) @ w (K, Cout) + bias, ReLU, store.
    r = jnp.dot(a_ref[...], w_ref[...], preferred_element_type=jnp.float32)
    r = r + b_ref[...]
    if has_relu:
        r = jnp.maximum(r, 0.0)
    o_ref[...] = r.astype(o_ref.dtype)


def _gemm_bias_relu_acc_kernel(a_ref, w_ref, b_ref, o_ref, acc_ref, *, has_relu):
    # K-split path: f32 accumulator initialized with the bias at k == 0.
    @pl.when(pl.program_id(1) == 0)
    def _init():
        acc_ref[...] = jnp.broadcast_to(b_ref[...], acc_ref.shape)

    acc_ref[...] += jnp.dot(a_ref[...], w_ref[...],
                            preferred_element_type=jnp.float32)

    @pl.when(pl.program_id(1) == pl.num_programs(1) - 1)
    def _finalize():
        r = acc_ref[...]
        if has_relu:
            r = jnp.maximum(r, 0.0)
        o_ref[...] = r.astype(o_ref.dtype)


def _fused_gemm_bn_relu(patches, w_folded, bias, *, has_relu,
                        mxu_dtype=jnp.float32, out_dtype=jnp.float32):
    """patches: (M, K), w_folded: (K, Cout), bias: (Cout,) -> (M, Cout)."""
    M, K = patches.shape
    Kw, Cout = w_folded.shape
    assert Kw == K
    in_bytes = jnp.dtype(mxu_dtype).itemsize
    plan = _plan(M, K, Cout, in_bytes)
    tm, M_pad, K_pad, tk = plan["tm"], plan["M_pad"], plan["K_pad"], plan["tk"]

    a = patches.astype(mxu_dtype)
    if (M_pad, K_pad) != (M, K):
        a = jnp.pad(a, ((0, M_pad - M), (0, K_pad - K)))
    w = w_folded.astype(mxu_dtype)
    if K_pad != K:
        w = jnp.pad(w, ((0, K_pad - K), (0, 0)))
    b = bias.reshape(1, Cout).astype(jnp.float32)

    out_bytes = jnp.dtype(out_dtype).itemsize
    cost = pl.CostEstimate(
        flops=2 * M_pad * K_pad * Cout,
        transcendentals=0,
        bytes_accessed=(M_pad * K_pad * in_bytes + K_pad * Cout * in_bytes
                        + Cout * 4 + M_pad * Cout * out_bytes))

    if plan["path"] == "single":
        out = pl.pallas_call(
            functools.partial(_gemm_bias_relu_kernel, has_relu=has_relu),
            out_shape=jax.ShapeDtypeStruct((M_pad, Cout), out_dtype),
            grid_spec=pltpu.PrefetchScalarGridSpec(
                num_scalar_prefetch=0,
                grid=(M_pad // tm,),
                in_specs=[
                    pl.BlockSpec((tm, K_pad), lambda i: (i, 0)),
                    pl.BlockSpec((K_pad, Cout), lambda i: (0, 0)),  # resident W
                    pl.BlockSpec((1, Cout), lambda i: (0, 0)),      # resident bias
                ],
                out_specs=pl.BlockSpec((tm, Cout), lambda i: (i, 0)),
            ),
            compiler_params=pltpu.CompilerParams(
                dimension_semantics=("parallel",),
                vmem_limit_bytes=plan["vmem_limit"]),
            cost_estimate=cost,
        )(a, w, b)
    else:
        out = pl.pallas_call(
            functools.partial(_gemm_bias_relu_acc_kernel, has_relu=has_relu),
            out_shape=jax.ShapeDtypeStruct((M_pad, Cout), out_dtype),
            grid_spec=pltpu.PrefetchScalarGridSpec(
                num_scalar_prefetch=0,
                grid=(M_pad // tm, K_pad // tk),
                in_specs=[
                    pl.BlockSpec((tm, tk), lambda i, k: (i, k)),
                    pl.BlockSpec((tk, Cout), lambda i, k: (k, 0)),
                    pl.BlockSpec((1, Cout), lambda i, k: (0, 0)),
                ],
                out_specs=pl.BlockSpec((tm, Cout), lambda i, k: (i, 0)),
                scratch_shapes=[pltpu.VMEM((tm, Cout), jnp.float32)],
            ),
            compiler_params=pltpu.CompilerParams(
                dimension_semantics=("parallel", "arbitrary"),
                vmem_limit_bytes=plan["vmem_limit"]),
            cost_estimate=cost,
        )(a, w, b)

    if M_pad != M:
        out = out[:M]
    return out


# ----------------------------------------------------------------------------
# Plain-JAX glue: NHWC im2col (tap-major, channel-minor K ordering).
# 1x1 convs skip im2col entirely.
# ----------------------------------------------------------------------------
def _im2col_nhwc(x_nhwc, kh, kw, stride, pad, dilation):
    N, H, W, C = x_nhwc.shape
    Hout = (H + 2 * pad - dilation * (kh - 1) - 1) // stride + 1
    Wout = (W + 2 * pad - dilation * (kw - 1) - 1) // stride + 1

    if kh == 1 and kw == 1 and pad == 0:
        p = x_nhwc
        if stride > 1:
            p = p[:, ::stride, ::stride, :]
        return p.reshape(N * Hout * Wout, C), Hout, Wout

    xp = jnp.pad(x_nhwc, ((0, 0), (pad, pad), (pad, pad), (0, 0)))
    cols = []
    for i in range(kh):
        for j in range(kw):
            r0, c0 = i * dilation, j * dilation
            cols.append(xp[:, r0: r0 + stride * (Hout - 1) + 1: stride,
                              c0: c0 + stride * (Wout - 1) + 1: stride, :])
    col = jnp.concatenate(cols, axis=-1)   # (N, Hout, Wout, kh*kw*C)
    return col.reshape(N * Hout * Wout, kh * kw * C), Hout, Wout


# ----------------------------------------------------------------------------
# ConvBnRelu module equivalent (inference-mode BatchNorm folded into the GEMM)
# ----------------------------------------------------------------------------
class ConvBnRelu:
    def __init__(self, in_planes, out_planes, ksize, stride, pad, dilation=1,
                 groups=1, has_bn=True, has_relu=True, has_bias=False,
                 key=None, eps=1e-5, mxu_dtype=jnp.float32,
                 out_dtype=jnp.float32):
        # mxu_dtype=jnp.bfloat16 halves A/W HBM reads on every TPU generation
        # (v5e's MXU is bf16-native too); accumulation stays f32 in-kernel.
        assert groups == 1, "groups > 1 not supported"
        if key is None:
            key = jax.random.PRNGKey(0)
        kw_, kb_, kg_, kbe_, km_, kv_ = jax.random.split(key, 6)

        self.in_planes, self.out_planes = in_planes, out_planes
        self.ksize, self.stride, self.pad, self.dilation = ksize, stride, pad, dilation
        self.has_bn, self.has_relu, self.has_bias = has_bn, has_relu, has_bias
        self.eps = eps
        self.mxu_dtype = mxu_dtype
        self.out_dtype = out_dtype

        # Deterministic synthetic parameters (shapes follow nn.Conv2d / nn.BatchNorm2d).
        fan_in = in_planes * ksize * ksize
        bound = 1.0 / jnp.sqrt(fan_in)
        self.weight = jax.random.uniform(
            kw_, (out_planes, in_planes, ksize, ksize),
            minval=-bound, maxval=bound, dtype=jnp.float32)
        self.conv_bias = (jax.random.uniform(
            kb_, (out_planes,), minval=-bound, maxval=bound, dtype=jnp.float32)
            if has_bias else jnp.zeros((out_planes,), jnp.float32))

        if has_bn:
            self.gamma = 1.0 + 0.1 * jax.random.normal(kg_, (out_planes,), jnp.float32)
            self.beta = 0.1 * jax.random.normal(kbe_, (out_planes,), jnp.float32)
            self.running_mean = 0.1 * jax.random.normal(km_, (out_planes,), jnp.float32)
            self.running_var = jnp.abs(
                1.0 + 0.1 * jax.random.normal(kv_, (out_planes,), jnp.float32))
        else:
            self.gamma = jnp.ones((out_planes,), jnp.float32)
            self.beta = jnp.zeros((out_planes,), jnp.float32)
            self.running_mean = jnp.zeros((out_planes,), jnp.float32)
            self.running_var = jnp.ones((out_planes,), jnp.float32)

    def _folded_weight_bias(self):
        if self.has_bn:
            scale = self.gamma / jnp.sqrt(self.running_var + self.eps)
            bias = self.beta + scale * (self.conv_bias - self.running_mean)
        else:
            scale = jnp.ones((self.out_planes,), jnp.float32)
            bias = self.conv_bias
        # K ordering = (kh, kw, Cin) to match the NHWC tap-major im2col layout.
        w = self.weight.transpose(2, 3, 1, 0).reshape(-1, self.out_planes)
        return w * scale[None, :], bias

    def __call__(self, x, channels_last=False):
        """x: (N, Cin, H, W) -> (N, Cout, Hout, Wout).

        Pass channels_last=True to feed / receive NHWC and skip the boundary
        transposes (preferred when chaining layers internally).
        """
        if not channels_last:
            x = x.transpose(0, 2, 3, 1)          # NCHW -> NHWC
        N = x.shape[0]
        patches, Hout, Wout = _im2col_nhwc(
            x, self.ksize, self.ksize, self.stride, self.pad, self.dilation)
        w_folded, bias = self._folded_weight_bias()
        out2d = _fused_gemm_bn_relu(patches, w_folded, bias,
                                    has_relu=self.has_relu,
                                    mxu_dtype=self.mxu_dtype,
                                    out_dtype=self.out_dtype)
        out = out2d.reshape(N, Hout, Wout, self.out_planes)
        if not channels_last:
            out = out.transpose(0, 3, 1, 2)      # NHWC -> NCHW (PyTorch parity)
        return out


# ----------------------------------------------------------------------------
# Reference (pure JAX) for a sanity check
# ----------------------------------------------------------------------------
def _reference(module, x):
    out = jax.lax.conv_general_dilated(
        x, module.weight,
        window_strides=(module.stride, module.stride),
        padding=[(module.pad, module.pad)] * 2,
        rhs_dilation=(module.dilation, module.dilation),
        dimension_numbers=("NCHW", "OIHW", "NCHW"))
    out = out + module.conv_bias[None, :, None, None]
    if module.has_bn:
        scale = module.gamma / jnp.sqrt(module.running_var + module.eps)
        out = (out - module.running_mean[None, :, None, None]) * \
            scale[None, :, None, None] + module.beta[None, :, None, None]
    if module.has_relu:
        out = jnp.maximum(out, 0.0)
    return out


if __name__ == "__main__":
    key = jax.random.PRNGKey(0)
    k_in, k1, k2 = jax.random.split(key, 3)

    N, Cin, H, W = 2, 4, 16, 16
    x = jax.random.normal(k_in, (N, Cin, H, W), dtype=jnp.float32)

    # 3x3 conv + BN + ReLU (general im2col path, small-K no-128-pad).
    m3 = ConvBnRelu(Cin, 8, 3, 1, 1, key=k1)
    out3 = jax.block_until_ready(m3(x))
    ref3 = jax.block_until_ready(_reference(m3, x))
    assert out3.shape == ref3.shape, (out3.shape, ref3.shape)
    assert float(jnp.max(jnp.abs(out3 - ref3))) < 1e-4, \
        float(jnp.max(jnp.abs(out3 - ref3)))

    # 1x1 conv + BN + ReLU (im2col-free fast path), chained on the 3x3 output.
    m1 = ConvBnRelu(8, 32, 1, 1, 0, key=k2)
    out1 = jax.block_until_ready(m1(out3))
    ref1 = jax.block_until_ready(_reference(m1, ref3))
    assert out1.shape == ref1.shape, (out1.shape, ref1.shape)
    assert float(jnp.max(jnp.abs(out1 - ref1))) < 1e-4, \
        float(jnp.max(jnp.abs(out1 - ref1)))

    # bf16 MXU inputs (f32 accumulation) — halves A/W HBM reads on any gen.
    m3b = ConvBnRelu(Cin, 8, 3, 1, 1, key=k1, mxu_dtype=jnp.bfloat16)
    out3b = jax.block_until_ready(m3b(x))
    assert float(jnp.max(jnp.abs(out3b - ref3))) < 1e-1, \
        float(jnp.max(jnp.abs(out3b - ref3)))

    print("KERNEL_OK")
</pallas_src>

<mosaic_0001>
module attributes {stable_mosaic.version = 11 : i64} {
  func.func @_gemm_bias_relu_kernel(%arg0: i32, %arg1: memref<256x40xf32, #tpu.memory_space<vmem>>, %arg2: memref<40x8xf32, #tpu.memory_space<vmem>>, %arg3: memref<1x8xf32, #tpu.memory_space<vmem>>, %arg4: memref<256x8xf32, #tpu.memory_space<vmem>>) attributes {dimension_semantics = [#tpu.dimension_semantics<parallel>], iteration_bounds = array<i64: 2>, scalar_prefetch = 0 : i64, scratch_operands = 0 : i64, tpu.core_type = #tpu.core_type<tc>, window_params = [{transform_indices = @transform_0, window_bounds = array<i64: 256, 40>}, {pipeline_mode = #tpu.pipeline_mode<synchronous>, transform_indices = @transform_1, window_bounds = array<i64: 40, 8>}, {pipeline_mode = #tpu.pipeline_mode<synchronous>, transform_indices = @transform_2, window_bounds = array<i64: 1, 8>}, {transform_indices = @transform_3, window_bounds = array<i64: 256, 8>}]} {
    %c0 = arith.constant 0 : index
    %c0_0 = arith.constant 0 : index
    %0 = vector.load %arg1[%c0, %c0_0] : memref<256x40xf32, #tpu.memory_space<vmem>>, vector<256x40xf32>
    %c0_1 = arith.constant 0 : index
    %c0_2 = arith.constant 0 : index
    %1 = vector.load %arg2[%c0_1, %c0_2] : memref<40x8xf32, #tpu.memory_space<vmem>>, vector<40x8xf32>
    %cst = arith.constant dense<0.000000e+00> : vector<256x8xf32>
    %2 = tpu.matmul %0, %1, %cst {dimension_numbers = #tpu.dot_dimension_numbers<[1], [0], [0], [1], [0, 0, 1, 1], [], []>} : vector<256x40xf32>, vector<40x8xf32>, vector<256x8xf32> -> vector<256x8xf32>
    %c0_3 = arith.constant 0 : index
    %c0_4 = arith.constant 0 : index
    %3 = vector.load %arg3[%c0_3, %c0_4] : memref<1x8xf32, #tpu.memory_space<vmem>>, vector<1x8xf32>
    %4 = vector.broadcast %3 : vector<1x8xf32> to vector<256x8xf32>
    %5 = arith.addf %2, %4 : vector<256x8xf32>
    %cst_5 = arith.constant 0.000000e+00 : f32
    %6 = vector.broadcast %cst_5 : f32 to vector<256x8xf32>
    %7 = arith.maximumf %5, %6 : vector<256x8xf32>
    %c0_6 = arith.constant 0 : index
    %c0_7 = arith.constant 0 : index
    %8 = vector.load %arg4[%c0_6, %c0_7] : memref<256x8xf32, #tpu.memory_space<vmem>>, vector<256x8xf32>
    tpu.vector_store %arg4[%c0_6, %c0_7], %7 {strides = array<i32>} : memref<256x8xf32, #tpu.memory_space<vmem>>, vector<256x8xf32>,
    return
  }
  func.func @transform_0(%arg0: i32) -> (i32, i32) {
    %c0_i32 = arith.constant 0 : i32
    %c0_i32_0 = arith.constant 0 : i32
    return %arg0, %c0_i32 : i32, i32
  }
  func.func @transform_1(%arg0: i32) -> (i32, i32) {
    %c0_i32 = arith.constant 0 : i32
    %c0_i32_0 = arith.constant 0 : i32
    %c0_i32_1 = arith.constant 0 : i32
    return %c0_i32, %c0_i32_0 : i32, i32
  }
  func.func @transform_2(%arg0: i32) -> (i32, i32) {
    %c0_i32 = arith.constant 0 : i32
    %c0_i32_0 = arith.constant 0 : i32
    %c0_i32_1 = arith.constant 0 : i32
    return %c0_i32, %c0_i32_0 : i32, i32
  }
  func.func @transform_3(%arg0: i32) -> (i32, i32) {
    %c0_i32 = arith.constant 0 : i32
    %c0_i32_0 = arith.constant 0 : i32
    return %arg0, %c0_i32 : i32, i32
  }
}

</mosaic_0001>

<bundles_post_ra>
// kernel: tpu_custom_call.1
= control target key start
LH: loop header
LB: loop body
LE: loop exit
PB: predicated region body
PF: predicated region fallthrough
CT: control target
= control target key end

     0   :  { %s641_s12 = smov 0   ;;  %s849_s0 = inlined_call_operand.vmem [shape: f32[512,40], index: 0, kind: input, shape index: {}]   ;;  %s850_s1 = inlined_call_operand.vmem [shape: f32[40,8], index: 1, kind: input, shape index: {}]   ;;  %s851_s2 = inlined_call_operand.vmem [shape: f32[1,8], index: 2, kind: input, shape index: {}]   ;;  %s852_s3 = inlined_call_operand.vmem [shape: f32[512,8], index: 3, kind: output, shape index: {}]  }
   0x1 LB: > { %s546_s13 = sadd.s32 4294967295, %s619_s12   ;;  %p550_p0 = scmp.ge.s32.totalorder %s619_s12, 1  ;;  %s619_s12 = sphi %s641_s12, %s13_s12  }
   0x2   : > { %p138_p1 = scmp.lt.s32.totalorder %s619_s12, 3 }
   0x4   : > { %p139_p2 = pnand %p550_p0, %p138_p1 }
   0x5   : > { %s551_s18 = sshll.u32 (!%p139_p2), %s546_s13, 5 }
   0x6   : > { %142 = sbr.rel (%p139_p2) target bundleno = 215 (0xd7), region = 32  ;;  %p163_p3 = scmp.lt.s32.totalorder (!%p139_p2), %s551_s18, 63 }
   0xb   : > { %v210_v0 = vld [vmem:[%s850_s1 + $0x20] sm:$0xff]  ;;  %v209_v1 = vld [vmem:[%s850_s1 + $0x18] sm:$0xff]  ;;  %v208_v2 = vld [vmem:[%s850_s1 + $0x10] sm:$0xff]  ;;  %s854_s18 = smov (!%p163_p3, %s551_s18), 63  ;;  %vm215_vm0 = vcmask 326656   ;;  %vm457_vm1 = vcmask 64512  }
   0xc   : > { %590 = vmatpush.msra.mxu2 %v210_v0  ;;  %591 = vmatpush.msra.mxu3 %v210_v0  ;;  %v207_v3 = vld [vmem:[%s850_s1 + $0x8] sm:$0xff]  ;;  %s552_s23 = sshll.u32 %s854_s18, 3  ;;  %v206_v4 = vld [vmem:[%s850_s1] sm:$0xff] }
   0xd   : > { %323 = vmatpush.msra.mxu0 %v210_v0  ;;  %589 = vmatpush.msra.mxu1 %v210_v0  ;;  %s672_s28 = scalar_lea.vmem %s849_s0, %s552_s23  ;;  %v741_v37 = vld [vmem:[%s851_s2] ss:$0 sm:$0xff]  ;;  %s750_s6 = scalar_lea.vmem %s852_s3, %s552_s23 }
   0xe   : > { %593 = vmatpush.msra.mxu2 %v209_v1  ;;  %594 = vmatpush.msra.mxu3 %v209_v1  ;;  %v190_v5 = vld [vmem:[%s672_s28 + $0x80] sm:$0xff]  ;;  %v191_v9 = vld [vmem:[%s672_s28 + $0x88] sm:$0xff]  ;;  %v192_v13 = vld [vmem:[%s672_s28 + $0x90] sm:$0xff] }
   0xf   : > { %324 = vmatpush.msra.mxu0 %v209_v1  ;;  %592 = vmatpush.msra.mxu1 %v209_v1  ;;  %v198_v6 = vld [vmem:[%s672_s28 + $0xc0] sm:$0xff]  ;;  %v199_v10 = vld [vmem:[%s672_s28 + $0xc8] sm:$0xff]  ;;  %v200_v14 = vld [vmem:[%s672_s28 + $0xd0] sm:$0xff] }
  0x10   : > { %596 = vmatpush.msra.mxu2 %v208_v2  ;;  %597 = vmatpush.msra.mxu3 %v208_v2  ;;  %v174_v7 = vld [vmem:[%s672_s28] sm:$0xff]  ;;  %v175_v11 = vld [vmem:[%s672_s28 + $0x8] sm:$0xff]  ;;  %v176_v15 = vld [vmem:[%s672_s28 + $0x10] sm:$0xff] }
  0x11   : > { %325 = vmatpush.msra.mxu0 %v208_v2  ;;  %595 = vmatpush.msra.mxu1 %v208_v2  ;;  %v182_v8 = vld [vmem:[%s672_s28 + $0x40] sm:$0xff]  ;;  %v183_v12 = vld [vmem:[%s672_s28 + $0x48] sm:$0xff]  ;;  %v184_v16 = vld [vmem:[%s672_s28 + $0x50] sm:$0xff] }
  0x12   : > { %599 = vmatpush.msra.mxu2 %v207_v3  ;;  %600 = vmatpush.msra.mxu3 %v207_v3  ;;  %v193_v17 = vld [vmem:[%s672_s28 + $0x98] sm:$0xff]  ;;  %v194_v21 = vld [vmem:[%s672_s28 + $0xa0] sm:$0xff]  ;;  %v195_v25 = vld [vmem:[%s672_s28 + $0xa8] sm:$0xff] }
  0x13   : > { %326 = vmatpush.msra.mxu0 %v207_v3  ;;  %598 = vmatpush.msra.mxu1 %v207_v3  ;;  %v201_v18 = vld [vmem:[%s672_s28 + $0xd8] sm:$0xff]  ;;  %v202_v22 = vld [vmem:[%s672_s28 + $0xe0] sm:$0xff]  ;;  %v203_v26 = vld [vmem:[%s672_s28 + $0xe8] sm:$0xff] }
  0x14   : > { %602 = vmatpush.msra.mxu2 %v206_v4  ;;  %603 = vmatpush.msra.mxu3 %v206_v4  ;;  %v177_v19 = vld [vmem:[%s672_s28 + $0x18] sm:$0xff]  ;;  %v178_v23 = vld [vmem:[%s672_s28 + $0x20] sm:$0xff]  ;;  %v179_v27 = vld [vmem:[%s672_s28 + $0x28] sm:$0xff] }
  0x15   : > { %571 = vmatmul.msk.f32.vlgmr.msra.gmra.mxu2 %vm215_vm0, %v190_v5  ;;  %579 = vmatmul.msk.f32.vlgmr.msra.gmra.mxu3 %vm215_vm0, %v198_v6  ;;  %v185_v20 = vld [vmem:[%s672_s28 + $0x58] sm:$0xff]  ;;  %v186_v24 = vld [vmem:[%s672_s28 + $0x60] sm:$0xff]  ;;  %v187_v28 = vld [vmem:[%s672_s28 + $0x68] sm:$0xff] }
  0x16   : > { %327 = vmatpush.msra.mxu0 %v206_v4  ;;  %601 = vmatpush.msra.mxu1 %v206_v4  ;;  %v196_v29 = vld [vmem:[%s672_s28 + $0xb0] sm:$0xff]  ;;  %v197_v33 = vld [vmem:[%s672_s28 + $0xb8] sm:$0xff] }
  0x17   : > { %555 = vmatmul.msk.f32.vlgmr.msra.gmra.mxu0 %vm215_vm0, %v174_v7  ;;  %563 = vmatmul.msk.f32.vlgmr.msra.gmra.mxu1 %vm215_vm0, %v182_v8  ;;  %v204_v30 = vld [vmem:[%s672_s28 + $0xf0] sm:$0xff]  ;;  %v205_v34 = vld [vmem:[%s672_s28 + $0xf8] sm:$0xff] }
  0x18   : > { %v180_v31 = vld [vmem:[%s672_s28 + $0x30] sm:$0xff]  ;;  %v181_v35 = vld [vmem:[%s672_s28 + $0x38] sm:$0xff] }
  0x19   : > { %v188_v32 = vld [vmem:[%s672_s28 + $0x70] sm:$0xff]  ;;  %v189_v36 = vld [vmem:[%s672_s28 + $0x78] sm:$0xff] }
  0x1d   : > { %572 = vmatmul.msk.f32.gmra.mxu2 %vm215_vm0, %v191_v9  ;;  %580 = vmatmul.msk.f32.gmra.mxu3 %vm215_vm0, %v199_v10 }
  0x1f   : > { %556 = vmatmul.msk.f32.gmra.mxu0 %vm215_vm0, %v175_v11  ;;  %564 = vmatmul.msk.f32.gmra.mxu1 %vm215_vm0, %v183_v12 }
  0x25   : > { %573 = vmatmul.msk.f32.gmra.mxu2 %vm215_vm0, %v192_v13  ;;  %581 = vmatmul.msk.f32.gmra.mxu3 %vm215_vm0, %v200_v14 }
  0x27   : > { %557 = vmatmul.msk.f32.gmra.mxu0 %vm215_vm0, %v176_v15  ;;  %565 = vmatmul.msk.f32.gmra.mxu1 %vm215_vm0, %v184_v16 }
  0x2d   : > { %574 = vmatmul.msk.f32.gmra.mxu2 %vm215_vm0, %v193_v17  ;;  %582 = vmatmul.msk.f32.gmra.mxu3 %vm215_vm0, %v201_v18 }
  0x2f   : > { %558 = vmatmul.msk.f32.gmra.mxu0 %vm215_vm0, %v177_v19  ;;  %566 = vmatmul.msk.f32.gmra.mxu1 %vm215_vm0, %v185_v20 }
  0x35   : > { %575 = vmatmul.msk.f32.gmra.mxu2 %vm215_vm0, %v194_v21  ;;  %583 = vmatmul.msk.f32.gmra.mxu3 %vm215_vm0, %v202_v22 }
  0x37   : > { %559 = vmatmul.msk.f32.gmra.mxu0 %vm215_vm0, %v178_v23  ;;  %567 = vmatmul.msk.f32.gmra.mxu1 %vm215_vm0, %v186_v24 }
  0x3d   : > { %576 = vmatmul.msk.f32.gmra.mxu2 %vm215_vm0, %v195_v25  ;;  %584 = vmatmul.msk.f32.gmra.mxu3 %vm215_vm0, %v203_v26 }
  0x3f   : > { %560 = vmatmul.msk.f32.gmra.mxu0 %vm215_vm0, %v179_v27  ;;  %568 = vmatmul.msk.f32.gmra.mxu1 %vm215_vm0, %v187_v28 }
  0x45   : > { %577 = vmatmul.msk.f32.gmra.mxu2 %vm215_vm0, %v196_v29  ;;  %585 = vmatmul.msk.f32.gmra.mxu3 %vm215_vm0, %v204_v30 }
  0x47   : > { %561 = vmatmul.msk.f32.gmra.mxu0 %vm215_vm0, %v180_v31  ;;  %569 = vmatmul.msk.f32.gmra.mxu1 %vm215_vm0, %v188_v32 }
  0x4d   : > { %578 = vmatmul.msk.f32.gmra.mxu2 %vm215_vm0, %v197_v33  ;;  %586 = vmatmul.msk.f32.gmra.mxu3 %vm215_vm0, %v205_v34 }
  0x4f   : > { %562 = vmatmul.msk.f32.gmra.mxu0 %vm215_vm0, %v181_v35  ;;  %570 = vmatmul.msk.f32.gmra.mxu1 %vm215_vm0, %v189_v36 }
  0x94   : > { %v329_v38 = vpop.f32.mrf.mxu0  ;;  %v353_v39 = vpop.f32.mrf.mxu1 }
  0x95   : > { %v330_v40 = vadd.f32 %v741_v37, %v329_v38  ;;  %v354_v41 = vadd.f32 %v741_v37, %v353_v39 }
  0x97   : > { %v425_v42 = vmax.f32 %v330_v40, 0.0  ;;  %v433_v43 = vmax.f32 %v354_v41, 0.0 }
  0x98   : > { %v377_v44 = vpop.f32.mrf.mxu2  ;;  %v401_v45 = vpop.f32.mrf.mxu3 }
  0x99   : > { %458 = vst.msk [vmem:[%s750_s6] sm:$0xff] %vm457_vm1, %v425_v42  ;;  %v378_v46 = vadd.f32 %v741_v37, %v377_v44  ;;  %v402_v47 = vadd.f32 %v741_v37, %v401_v45 }
  0x9a   : > { %466 = vst.msk [vmem:[%s750_s6 + $0x40] sm:$0xff] %vm457_vm1, %v433_v43 }
  0x9b   : > { %v441_v48 = vmax.f32 %v378_v46, 0.0  ;;  %v449_v49 = vmax.f32 %v402_v47, 0.0 }
  0x9c   : > { %v332_v50 = vpop.f32.mrf.mxu0  ;;  %v356_v51 = vpop.f32.mrf.mxu1 }
  0x9d   : > { %474 = vst.msk [vmem:[%s750_s6 + $0x80] sm:$0xff] %vm457_vm1, %v441_v48  ;;  %v333_v52 = vadd.f32 %v741_v37, %v332_v50  ;;  %v357_v53 = vadd.f32 %v741_v37, %v356_v51 }
  0x9e   : > { %482 = vst.msk [vmem:[%s750_s6 + $0xc0] sm:$0xff] %vm457_vm1, %v449_v49 }
  0x9f   : > { %v426_v54 = vmax.f32 %v333_v52, 0.0  ;;  %v434_v55 = vmax.f32 %v357_v53, 0.0 }
  0xa0   : > { %v380_v56 = vpop.f32.mrf.mxu2  ;;  %v404_v57 = vpop.f32.mrf.mxu3 }
  0xa1   : > { %459 = vst.msk [vmem:[%s750_s6 + $0x8] sm:$0xff] %vm457_vm1, %v426_v54  ;;  %v381_v58 = vadd.f32 %v741_v37, %v380_v56  ;;  %v405_v59 = vadd.f32 %v741_v37, %v404_v57 }
  0xa2   : > { %467 = vst.msk [vmem:[%s750_s6 + $0x48] sm:$0xff] %vm457_vm1, %v434_v55 }
  0xa3   : > { %v442_v60 = vmax.f32 %v381_v58, 0.0  ;;  %v450_v61 = vmax.f32 %v405_v59, 0.0 }
  0xa4   : > { %v335_v62 = vpop.f32.mrf.mxu0  ;;  %v359_v63 = vpop.f32.mrf.mxu1 }
  0xa5   : > { %475 = vst.msk [vmem:[%s750_s6 + $0x88] sm:$0xff] %vm457_vm1, %v442_v60  ;;  %v336_v0 = vadd.f32 %v741_v37, %v335_v62  ;;  %v360_v1 = vadd.f32 %v741_v37, %v359_v63 }
  0xa6   : > { %483 = vst.msk [vmem:[%s750_s6 + $0xc8] sm:$0xff] %vm457_vm1, %v450_v61 }
  0xa7   : > { %v427_v2 = vmax.f32 %v336_v0, 0.0  ;;  %v435_v3 = vmax.f32 %v360_v1, 0.0 }
  0xa8   : > { %v383_v4 = vpop.f32.mrf.mxu2  ;;  %v407_v5 = vpop.f32.mrf.mxu3 }
  0xa9   : > { %460 = vst.msk [vmem:[%s750_s6 + $0x10] sm:$0xff] %vm457_vm1, %v427_v2  ;;  %v384_v6 = vadd.f32 %v741_v37, %v383_v4  ;;  %v408_v7 = vadd.f32 %v741_v37, %v407_v5 }
  0xaa   : > { %468 = vst.msk [vmem:[%s750_s6 + $0x50] sm:$0xff] %vm457_vm1, %v435_v3 }
  0xab   : > { %v443_v8 = vmax.f32 %v384_v6, 0.0  ;;  %v451_v9 = vmax.f32 %v408_v7, 0.0 }
  0xac   : > { %v338_v10 = vpop.f32.mrf.mxu0  ;;  %v362_v11 = vpop.f32.mrf.mxu1 }
  0xad   : > { %476 = vst.msk [vmem:[%s750_s6 + $0x90] sm:$0xff] %vm457_vm1, %v443_v8  ;;  %v339_v12 = vadd.f32 %v741_v37, %v338_v10  ;;  %v363_v13 = vadd.f32 %v741_v37, %v362_v11 }
  0xae   : > { %484 = vst.msk [vmem:[%s750_s6 + $0xd0] sm:$0xff] %vm457_vm1, %v451_v9 }
  0xaf   : > { %v428_v14 = vmax.f32 %v339_v12, 0.0  ;;  %v436_v15 = vmax.f32 %v363_v13, 0.0 }
  0xb0   : > { %v386_v16 = vpop.f32.mrf.mxu2  ;;  %v410_v17 = vpop.f32.mrf.mxu3 }
  0xb1   : > { %461 = vst.msk [vmem:[%s750_s6 + $0x18] sm:$0xff] %vm457_vm1, %v428_v14  ;;  %v387_v18 = vadd.f32 %v741_v37, %v386_v16  ;;  %v411_v19 = vadd.f32 %v741_v37, %v410_v17 }
  0xb2   : > { %469 = vst.msk [vmem:[%s750_s6 + $0x58] sm:$0xff] %vm457_vm1, %v436_v15 }
  0xb3   : > { %v444_v20 = vmax.f32 %v387_v18, 0.0  ;;  %v452_v21 = vmax.f32 %v411_v19, 0.0 }
  0xb4   : > { %v341_v22 = vpop.f32.mrf.mxu0  ;;  %v365_v23 = vpop.f32.mrf.mxu1 }
  0xb5   : > { %477 = vst.msk [vmem:[%s750_s6 + $0x98] sm:$0xff] %vm457_vm1, %v444_v20  ;;  %v342_v24 = vadd.f32 %v741_v37, %v341_v22  ;;  %v366_v25 = vadd.f32 %v741_v37, %v365_v23 }
  0xb6   : > { %485 = vst.msk [vmem:[%s750_s6 + $0xd8] sm:$0xff] %vm457_vm1, %v452_v21 }
  0xb7   : > { %v429_v26 = vmax.f32 %v342_v24, 0.0  ;;  %v437_v27 = vmax.f32 %v366_v25, 0.0 }
  0xb8   : > { %v389_v28 = vpop.f32.mrf.mxu2  ;;  %v413_v29 = vpop.f32.mrf.mxu3 }
  0xb9   : > { %462 = vst.msk [vmem:[%s750_s6 + $0x20] sm:$0xff] %vm457_vm1, %v429_v26  ;;  %v390_v30 = vadd.f32 %v741_v37, %v389_v28  ;;  %v414_v31 = vadd.f32 %v741_v37, %v413_v29 }
  0xba   : > { %470 = vst.msk [vmem:[%s750_s6 + $0x60] sm:$0xff] %vm457_vm1, %v437_v27 }
  0xbb   : > { %v445_v32 = vmax.f32 %v390_v30, 0.0  ;;  %v453_v33 = vmax.f32 %v414_v31, 0.0 }
  0xbc   : > { %v344_v34 = vpop.f32.mrf.mxu0  ;;  %v368_v35 = vpop.f32.mrf.mxu1 }
  0xbd   : > { %478 = vst.msk [vmem:[%s750_s6 + $0xa0] sm:$0xff] %vm457_vm1, %v445_v32  ;;  %v345_v36 = vadd.f32 %v741_v37, %v344_v34  ;;  %v369_v38 = vadd.f32 %v741_v37, %v368_v35 }
  0xbe   : > { %486 = vst.msk [vmem:[%s750_s6 + $0xe0] sm:$0xff] %vm457_vm1, %v453_v33 }
  0xbf   : > { %v430_v39 = vmax.f32 %v345_v36, 0.0  ;;  %v438_v40 = vmax.f32 %v369_v38, 0.0 }
  0xc0   : > { %v392_v41 = vpop.f32.mrf.mxu2  ;;  %v416_v42 = vpop.f32.mrf.mxu3 }
  0xc1   : > { %463 = vst.msk [vmem:[%s750_s6 + $0x28] sm:$0xff] %vm457_vm1, %v430_v39  ;;  %v393_v43 = vadd.f32 %v741_v37, %v392_v41  ;;  %v417_v44 = vadd.f32 %v741_v37, %v416_v42 }
  0xc2   : > { %471 = vst.msk [vmem:[%s750_s6 + $0x68] sm:$0xff] %vm457_vm1, %v438_v40 }
  0xc3   : > { %v446_v45 = vmax.f32 %v393_v43, 0.0  ;;  %v454_v46 = vmax.f32 %v417_v44, 0.0 }
  0xc4   : > { %v347_v47 = vpop.f32.mrf.mxu0  ;;  %v371_v48 = vpop.f32.mrf.mxu1 }
  0xc5   : > { %479 = vst.msk [vmem:[%s750_s6 + $0xa8] sm:$0xff] %vm457_vm1, %v446_v45  ;;  %v348_v49 = vadd.f32 %v741_v37, %v347_v47  ;;  %v372_v50 = vadd.f32 %v741_v37, %v371_v48 }
  0xc6   : > { %487 = vst.msk [vmem:[%s750_s6 + $0xe8] sm:$0xff] %vm457_vm1, %v454_v46 }
  0xc7   : > { %v431_v51 = vmax.f32 %v348_v49, 0.0  ;;  %v439_v52 = vmax.f32 %v372_v50, 0.0 }
  0xc8   : > { %v395_v53 = vpop.f32.mrf.mxu2  ;;  %v419_v54 = vpop.f32.mrf.mxu3 }
  0xc9   : > { %464 = vst.msk [vmem:[%s750_s6 + $0x30] sm:$0xff] %vm457_vm1, %v431_v51  ;;  %v396_v55 = vadd.f32 %v741_v37, %v395_v53  ;;  %v420_v56 = vadd.f32 %v741_v37, %v419_v54 }
  0xca   : > { %472 = vst.msk [vmem:[%s750_s6 + $0x70] sm:$0xff] %vm457_vm1, %v439_v52 }
  0xcb   : > { %v447_v57 = vmax.f32 %v396_v55, 0.0  ;;  %v455_v58 = vmax.f32 %v420_v56, 0.0 }
  0xcc   : > { %v350_v59 = vpop.f32.mrf.mxu0  ;;  %v374_v60 = vpop.f32.mrf.mxu1 }
  0xcd   : > { %480 = vst.msk [vmem:[%s750_s6 + $0xb0] sm:$0xff] %vm457_vm1, %v447_v57  ;;  %v351_v61 = vadd.f32 %v741_v37, %v350_v59  ;;  %v375_v62 = vadd.f32 %v741_v37, %v374_v60 }
  0xce   : > { %488 = vst.msk [vmem:[%s750_s6 + $0xf0] sm:$0xff] %vm457_vm1, %v455_v58 }
  0xcf   : > { %v432_v63 = vmax.f32 %v351_v61, 0.0  ;;  %v440_v0 = vmax.f32 %v375_v62, 0.0 }
  0xd0   : > { %v398_v1 = vpop.f32.mrf.mxu2  ;;  %v422_v2 = vpop.f32.mrf.mxu3 }
  0xd1   : > { %465 = vst.msk [vmem:[%s750_s6 + $0x38] sm:$0xff] %vm457_vm1, %v432_v63  ;;  %v399_v3 = vadd.f32 %v741_v37, %v398_v1  ;;  %v423_v4 = vadd.f32 %v741_v37, %v422_v2 }
  0xd2   : > { %473 = vst.msk [vmem:[%s750_s6 + $0x78] sm:$0xff] %vm457_vm1, %v440_v0 }
  0xd3   : > { %v448_v5 = vmax.f32 %v399_v3, 0.0  ;;  %v456_v6 = vmax.f32 %v423_v4, 0.0 }
  0xd5   : > { %481 = vst.msk [vmem:[%s750_s6 + $0xb8] sm:$0xff] %vm457_vm1, %v448_v5 }
  0xd6   : > { %489 = vst.msk [vmem:[%s750_s6 + $0xf8] sm:$0xff] %vm457_vm1, %v456_v6 }
  0xd7 PF: > { %s13_s12 = sadd.s32 1, %s619_s12  }
  0xd8   : > { %p10_p4 = scmp.ge.s32.totalorder %s13_s12, 4  }
  0xda   :  { %12 = sbr.rel (!%p10_p4) target bundleno = 1 (0x1), region = 62 }

</bundles_post_ra>
